<compile_context>
chip_gen: v7x
topology: tpu7x:2x2x1
jax: 0.10.0
libtpu: 0.0.40
codegen_flags: <defaults>
</compile_context>

<pallas_src>
import functools
import math

import jax
import jax.numpy as jnp
from jax.experimental import pallas as pl
from jax.experimental.pallas import tpu as pltpu


def _round_up(x, m):
    return ((x + m - 1) // m) * m


# --------------------------------------------------------------------------------------
# Fast path: VMEM-resident table, on-chip one-hot (MXU) gather.
# --------------------------------------------------------------------------------------
def _embed_onehot_kernel(ids_ref, table_ref, out_ref, *, vocab_size, scale):
    """ids_ref: VMEM (tb, 1) int32; table_ref: VMEM (V, E); out_ref: VMEM (tb, E)."""
    ids = ids_ref[...]                                                   # (tb, 1) int32
    tb = ids.shape[0]
    iota = jax.lax.broadcasted_iota(jnp.int32, (tb, vocab_size), 1)      # (tb, V)
    one_hot = (ids == iota).astype(table_ref.dtype)                      # (tb, V)
    gathered = jnp.dot(one_hot, table_ref[...],
                       preferred_element_type=jnp.float32)               # (tb, E) f32
    out_ref[...] = (gathered * scale).astype(out_ref.dtype)


# --------------------------------------------------------------------------------------
# General path: HBM table, manual per-row DMA gather straight into the output block.
# --------------------------------------------------------------------------------------
def _embed_dma_kernel(ids_ref, table_hbm, out_ref, sem, *,
                      token_block, group, groups_inflight, scale):
    """ids_ref : SMEM int32 (padded_tokens + group*groups_inflight,)   (scalar prefetch)
       table_hbm: HBM (V, E) raw ref (never copied whole)
       out_ref : VMEM (tb, E) pipelined output block (DMA lands here directly)
       sem     : DMA semaphores (group * groups_inflight,)
    """
    n_groups = token_block // group
    base = pl.multiple_of(pl.program_id(0) * token_block, 8)

    def read_ids(g):
        # SMEM scalar reads for one group of rows (statically unrolled).
        return [ids_ref[base + g * group + j] for j in range(group)]

    def start_group(g, toks):
        for j in range(group):
            pltpu.make_async_copy(
                table_hbm.at[toks[j]],                       # (E,) row in HBM
                out_ref.at[g * group + j],                   # (E,) row of the out block
                sem.at[(g % groups_inflight) * group + j],
            ).start()

    def wait_group(g):
        # Static src row: only the copy size / sem slot matter for the wait,
        # so no id is re-read behind the wait.
        for j in range(group):
            pltpu.make_async_copy(
                table_hbm.at[0],
                out_ref.at[g * group + j],
                sem.at[(g % groups_inflight) * group + j],
            ).wait()

    # Prime the in-flight window (static Python unroll).
    for g in range(min(groups_inflight, n_groups)):
        start_group(g, read_ids(g))

    @pl.loop(0, n_groups)
    def _(g):
        nxt = g + groups_inflight
        # Hoist the SMEM id reads for the next group ahead of the waits.
        nxt_toks = read_ids(nxt)   # always in-bounds: ids are padded by the window size
        wait_group(g)

        @pl.when(nxt < n_groups)
        def _():
            start_group(nxt, nxt_toks)

    # Single VPU pass over the lane-dense (tb, E) tile; scale in f32 for dtype parity.
    out_ref[...] = (out_ref[...].astype(jnp.float32) * scale).astype(out_ref.dtype)


# --------------------------------------------------------------------------------------
# Dispatch wrapper == Embeddings.forward
# --------------------------------------------------------------------------------------
def embeddings_forward(batch_inputs, table, *, token_block=1024,
                       rows_per_group=8, groups_inflight=4):
    """Pallas equivalent of Embeddings.forward: table[ids] * sqrt(embedding_size)."""
    vocab_size, embedding_size = table.shape
    itemsize = jnp.dtype(table.dtype).itemsize
    scale = math.sqrt(embedding_size)

    in_shape = batch_inputs.shape
    ids_flat = batch_inputs.reshape(-1).astype(jnp.int32)
    num_tokens = ids_flat.shape[0]

    # Token tile: large by default (amortizes per-step overhead), multiple of 8, and
    # clamped so the double-buffered (tb, E) out block stays <= 16 MiB (v7x-safe).
    tb = min(token_block, _round_up(num_tokens, 8))
    max_tb = max(8, ((16 * 1024 * 1024) // (2 * embedding_size * itemsize)) // 8 * 8)
    tb = max(8, min(_round_up(tb, 8), max_tb))

    padded = _round_up(num_tokens, tb)
    grid = (padded // tb,)

    vmem_limit = 32 * 1024 * 1024
    use_fast_path = (vocab_size <= 1024 and
                     vocab_size * embedding_size * itemsize <= 2 * 1024 * 1024)

    if use_fast_path:
        ids_p = jnp.pad(ids_flat, (0, padded - num_tokens)).reshape(padded, 1)
        out = pl.pallas_call(
            functools.partial(_embed_onehot_kernel,
                              vocab_size=vocab_size, scale=scale),
            out_shape=jax.ShapeDtypeStruct((padded, embedding_size), table.dtype),
            grid=grid,
            in_specs=[
                pl.BlockSpec((tb, 1), lambda i: (i, 0)),                       # ids
                pl.BlockSpec((vocab_size, embedding_size), lambda i: (0, 0)),  # resident table
            ],
            out_specs=pl.BlockSpec((tb, embedding_size), lambda i: (i, 0)),
            compiler_params=pltpu.CompilerParams(
                dimension_semantics=("parallel",),
                vmem_limit_bytes=vmem_limit,
            ),
            cost_estimate=pl.CostEstimate(
                flops=2 * padded * vocab_size * embedding_size,
                transcendentals=0,
                bytes_accessed=(padded * embedding_size
                                + vocab_size * embedding_size) * itemsize + 4 * padded,
            ),
        )(ids_p, table)
    else:
        # Sanitize the group / window parameters (tb is always a multiple of 8).
        group = rows_per_group if (rows_per_group > 0 and tb % rows_per_group == 0) else 8
        group = min(group, tb)
        groups_inflight = max(1, groups_inflight)

        # Extra padding so hoisted next-group id reads never go out of bounds.
        extra = group * groups_inflight
        ids_p = jnp.pad(ids_flat, (0, padded - num_tokens + extra))

        kernel = functools.partial(
            _embed_dma_kernel, token_block=tb, group=group,
            groups_inflight=groups_inflight, scale=scale)

        out = pl.pallas_call(
            kernel,
            out_shape=jax.ShapeDtypeStruct((padded, embedding_size), table.dtype),
            grid_spec=pltpu.PrefetchScalarGridSpec(
                num_scalar_prefetch=1,                       # ids -> SMEM, drive DMA addresses
                grid=grid,
                in_specs=[
                    pl.BlockSpec(memory_space=pl.ANY),       # table stays in HBM
                ],
                out_specs=pl.BlockSpec((tb, embedding_size), lambda i, ids: (i, 0)),
                scratch_shapes=[
                    pltpu.SemaphoreType.DMA((group * groups_inflight,)),
                ],
            ),
            compiler_params=pltpu.CompilerParams(
                dimension_semantics=("parallel",),           # v7x: both TCs issue DMAs
                vmem_limit_bytes=vmem_limit,
            ),
            cost_estimate=pl.CostEstimate(
                flops=padded * embedding_size,
                transcendentals=0,
                bytes_accessed=2 * padded * embedding_size * itemsize + 4 * padded,
            ),
        )(ids_p, table)

    out = out[:num_tokens]
    return out.reshape(*in_shape, embedding_size)


if __name__ == "__main__":
    key = jax.random.PRNGKey(0)
    k1, k2, k3, k4 = jax.random.split(key, 4)

    batch, seq = 2, 8
    embedding_size = 128

    # Case 1: small vocab -> VMEM-resident table, on-chip one-hot gather fast path.
    vocab_small = 64
    table_s = jax.random.normal(k1, (vocab_small, embedding_size), dtype=jnp.float32)
    ids_s = jax.random.randint(k2, (batch, seq), 0, vocab_small, dtype=jnp.int32)
    out_s = jax.block_until_ready(embeddings_forward(ids_s, table_s))
    ref_s = table_s[ids_s] * math.sqrt(embedding_size)
    assert out_s.shape == (batch, seq, embedding_size), out_s.shape
    assert jnp.allclose(out_s, ref_s, atol=1e-5, rtol=1e-5), "fast-path mismatch"

    # Case 2: larger vocab -> HBM table + manual windowed DMA row-gather path.
    vocab_big = 2048
    table_b = jax.random.normal(k3, (vocab_big, embedding_size), dtype=jnp.float32)
    ids_b = jax.random.randint(k4, (batch, seq), 0, vocab_big, dtype=jnp.int32)
    out_b = jax.block_until_ready(embeddings_forward(ids_b, table_b))
    ref_b = table_b[ids_b] * math.sqrt(embedding_size)
    assert out_b.shape == (batch, seq, embedding_size), out_b.shape
    assert jnp.allclose(out_b, ref_b, atol=1e-5, rtol=1e-5), "dma-path mismatch"

    print("KERNEL_OK")
</pallas_src>

<mosaic_0001>
module attributes {stable_mosaic.version = 11 : i64} {
  func.func @_embed_onehot_kernel(%arg0: i32, %arg1: memref<16x1xi32, #tpu.memory_space<vmem>>, %arg2: memref<64x128xf32, #tpu.memory_space<vmem>>, %arg3: memref<16x128xf32, #tpu.memory_space<vmem>>) attributes {dimension_semantics = [#tpu.dimension_semantics<parallel>], iteration_bounds = array<i64: 1>, scalar_prefetch = 0 : i64, scratch_operands = 0 : i64, tpu.core_type = #tpu.core_type<tc>, window_params = [{transform_indices = @transform_0, window_bounds = array<i64: 16, 1>}, {pipeline_mode = #tpu.pipeline_mode<synchronous>, transform_indices = @transform_1, window_bounds = array<i64: 64, 128>}, {transform_indices = @transform_2, window_bounds = array<i64: 16, 128>}]} {
    %c0 = arith.constant 0 : index
    %c0_0 = arith.constant 0 : index
    %0 = vector.load %arg1[%c0, %c0_0] : memref<16x1xi32, #tpu.memory_space<vmem>>, vector<16x1xi32>
    %1 = tpu.iota {dimensions = array<i32: 1>} : vector<16x64xi32>
    %2 = vector.broadcast %0 : vector<16x1xi32> to vector<16x64xi32>
    %3 = arith.cmpi eq, %2, %1 : vector<16x64xi32>
    %4 = arith.extui %3 : vector<16x64xi1> to vector<16x64xi32>
    %5 = arith.sitofp %4 : vector<16x64xi32> to vector<16x64xf32>
    %c0_1 = arith.constant 0 : index
    %c0_2 = arith.constant 0 : index
    %6 = vector.load %arg2[%c0_1, %c0_2] : memref<64x128xf32, #tpu.memory_space<vmem>>, vector<64x128xf32>
    %cst = arith.constant dense<0.000000e+00> : vector<16x128xf32>
    %7 = tpu.matmul %5, %6, %cst {dimension_numbers = #tpu.dot_dimension_numbers<[1], [0], [0], [1], [0, 0, 1, 1], [], []>} : vector<16x64xf32>, vector<64x128xf32>, vector<16x128xf32> -> vector<16x128xf32>
    %cst_3 = arith.constant 11.3137083 : f32
    %8 = vector.broadcast %cst_3 : f32 to vector<16x128xf32>
    %9 = arith.mulf %7, %8 : vector<16x128xf32>
    %c0_4 = arith.constant 0 : index
    %c0_5 = arith.constant 0 : index
    %10 = vector.load %arg3[%c0_4, %c0_5] : memref<16x128xf32, #tpu.memory_space<vmem>>, vector<16x128xf32>
    tpu.vector_store %arg3[%c0_4, %c0_5], %9 {strides = array<i32>} : memref<16x128xf32, #tpu.memory_space<vmem>>, vector<16x128xf32>,
    return
  }
  func.func @transform_0(%arg0: i32) -> (i32, i32) {
    %c0_i32 = arith.constant 0 : i32
    %c0_i32_0 = arith.constant 0 : i32
    return %arg0, %c0_i32 : i32, i32
  }
  func.func @transform_1(%arg0: i32) -> (i32, i32) {
    %c0_i32 = arith.constant 0 : i32
    %c0_i32_0 = arith.constant 0 : i32
    %c0_i32_1 = arith.constant 0 : i32
    return %c0_i32, %c0_i32_0 : i32, i32
  }
  func.func @transform_2(%arg0: i32) -> (i32, i32) {
    %c0_i32 = arith.constant 0 : i32
    %c0_i32_0 = arith.constant 0 : i32
    return %arg0, %c0_i32 : i32, i32
  }
}

</mosaic_0001>

<bundles_post_ra>
// kernel: tpu_custom_call.1
= control target key start
LH: loop header
LB: loop body
LE: loop exit
PB: predicated region body
PF: predicated region fallthrough
CT: control target
= control target key end

     0   :  { %7 = vsyncpa [#allocation3], 0  ;;  %s314_s0 = inlined_call_operand.vmem [shape: s32[16,1], index: 0, kind: input, shape index: {}]   ;;  %s315_s1 = inlined_call_operand.hbm [shape: f32[64,128], index: 1, kind: input, shape index: {}]   ;;  %s316_s2 = inlined_call_operand.hbm [shape: f32[16,128], index: 2, kind: output, shape index: {}]  }
   0x1   :  { %8 = vsyncpa [#allocation4], 0  ;;  %s257_s9 = smov [#allocation2]   ;;  %s209_s13 = scalar_lea.hbm %s315_s1, 1024 }
   0x2   :  { %s16_s10 = sshll.u32 %s257_s9, 4  ;;  %p210_p0 = scmp.ne.s32.totalorder %s315_s1, %s209_s13  ;;  %s17_s10 = int_to_ptr.vmem [resolvable:$true] %s16_s10 }
   0x3   :  { %p213_p1 = scmp.lt.u32.totalorder %s209_s13, %s315_s1 }
   0x5   :  { %p215_p2 = pnand %p213_p1, %p210_p0 }
   0x7   :  { %218 = shalt.err (!%p215_p2)
}
   0x8   :  { %s219_s18 = scalar_lea.vmem %s17_s10, 1024  ;;  %p224_p4 = scmp.lt.s32.totalorder %s17_s10, %s17_s10 }
   0x9   :  { %p220_p3 = scmp.ne.s32.totalorder %s17_s10, %s219_s18  ;;  %p225_p5 = scmp.lt.s32.totalorder %s219_s18, %s219_s18 }
   0xb   :  { %p226_p6 = por %p225_p5, %p224_p4 }
   0xd   :  { %p227_p7 = pnand %p226_p6, %p220_p3 }
   0xf   :  { %230 = shalt.err (!%p227_p7)
}
  0x10   :  { %s258_s19 = smov 128   ;;  %s259_s20 = smov 8  }
  0x11   :  { %22 = dma.hbm_to_vmem [thread:$0]  %s315_s1, 1024, %s17_s10, [#allocation3], %s258_s19, %s258_s19, %s259_s20  }
  0x12   :  { %253 = dma.done.wait [#allocation3], 1024  }
  0x13   :  { %254 = vsyncadd [#allocation3], 4294966272  ;;  %v260_v0 = vmov 0   ;;  %v26_v1 = vld [vmem:[%s314_s0] sm:$0xff]  ;;  %v43_v3 = vld [vmem:[#allocation2 + $0x8] sm:$0xff]  ;;  %v28_v15 = vlaneseq  ;;  %vm50_vm0 = vcmask 523264  }
  0x14   :  { %208 = vset.pattern.permute.xlu0 %v260_v0  ;;  %v42_v2 = vld [vmem:[#allocation2] sm:$0xff]  ;;  %v44_v4 = vld [vmem:[#allocation2 + $0x10] sm:$0xff]  ;;  %v45_v5 = vld [vmem:[#allocation2 + $0x18] sm:$0xff]  ;;  %v261_v18 = vmov 0.0  }
  0x15   :  { %31 = vperm.xlu0 %208, %v26_v1   ;;  %v27_v6 = vld [vmem:[%s314_s0 + $0x8] sm:$0xff]  ;;  %v186_v7 = vpack.c.bf16 %v43_v3, %v42_v2  ;;  %v190_v8 = vpack.c.bf16 %v45_v5, %v44_v4  ;;  %v46_v9 = vld [vmem:[#allocation2 + $0x20] sm:$0xff]  ;;  %v48_v12 = vld [vmem:[#allocation2 + $0x30] sm:$0xff]  ;;  %v29_v16 = vand.u32 127, %v28_v15  ;;  %s262_s0 = smov [#allocation5]  }
  0x16   :  { %v47_v10 = vld [vmem:[#allocation2 + $0x28] sm:$0xff]  ;;  %v49_v13 = vld [vmem:[#allocation2 + $0x38] sm:$0xff]  ;;  %s141_s1 = sshll.u32 %s262_s0, 4  ;;  %s142_s1 = int_to_ptr.vmem [resolvable:$true] %s141_s1 }
  0x17   :  { %187 = vmatprep.subr.bf16.mxu0 %v186_v7  ;;  %v194_v11 = vpack.c.bf16 %v47_v10, %v46_v9  ;;  %v198_v14 = vpack.c.bf16 %v49_v13, %v48_v12  ;;  %s231_s27 = scalar_lea.vmem %s142_s1, 256  ;;  %p236_p9 = scmp.lt.s32.totalorder %s142_s1, %s142_s1 }
  0x18   :  { %189 = vmatpush3.bf16.msra.mxu0 %v186_v7  ;;  %p232_p8 = scmp.ne.s32.totalorder %s142_s1, %s231_s27  ;;  %p237_p10 = scmp.lt.s32.totalorder %s231_s27, %s231_s27 }
  0x19   :  { %34 = vperm.xlu0 %208, %v27_v6   ;;  %191 = vmatprep.subr.bf16.mxu0 %v190_v8 }
  0x1a   :  { %p238_p11 = por %p237_p10, %p236_p9 }
  0x1c   :  { %193 = vmatpush3.bf16.msra.mxu0 %v190_v8  ;;  %p239_p12 = pnand %p238_p11, %p232_p8 }
  0x1d   :  { %195 = vmatprep.subr.bf16.mxu0 %v194_v11 }
  0x20   :  { %197 = vmatpush3.bf16.msra.mxu0 %v194_v11 }
  0x21   :  { %199 = vmatprep.subr.bf16.mxu0 %v198_v14 }
  0x24   :  { %201 = vmatpush3.bf16.msra.mxu0 %v198_v14 }
  0x94   :  { %v32_v17 = vpop.permute.xlu0 %31 }
  0x95   :  { %vm36_vm1 = vcmp.eq.s32.totalorder %v32_v17, %v29_v16 }
  0x96   :  { %v153_v19 = vsel %vm36_vm1, 1.0, %v261_v18 }
  0x97   :  { %183 = vmatprep.mubr.msk.f32.mxu0 %vm50_vm0, %v153_v19 }
  0x98   :  { %v35_v20 = vpop.permute.xlu0 %34 }
  0x99   :  { %vm37_vm2 = vcmp.eq.s32.totalorder %v35_v20, %v29_v16 }
  0x9a   :  { %v154_v21 = vsel %vm37_vm2, 1.0, %v261_v18 }
  0x9b   :  { %184 = vmatmul.mubr.msk.f32.vlgmr.msra.gmra.mrb[0].mxu0 %vm50_vm0, %v154_v21 }
 0x16e   :  { %v185_v22 = vpop.f32.mrb[0].mxu0 }
 0x16f   :  { %v133_v23 = vmul.f32 11.313708, %v185_v22  ;;  %v123_v24 = vpop.f32.mrb[1].mxu0 }
 0x170   :  { %v132_v25 = vmul.f32 11.313708, %v123_v24 }
 0x171   :  { %135 = vst [vmem:[#allocation5 + $0x8] sm:$0xff] %v133_v23 }
 0x172   :  { %134 = vst [vmem:[#allocation5] sm:$0xff] %v132_v25 }
 0x173   :  { %242 = shalt.err (!%p239_p12)
}
 0x174   :  { %s243_s30 = scalar_lea.hbm %s316_s2, 256 }
 0x175   :  { %p244_p13 = scmp.ne.s32.totalorder %s316_s2, %s243_s30  ;;  %p247_p0 = scmp.lt.u32.totalorder %s243_s30, %s316_s2 }
 0x177   :  { %p249_p1 = pnand %p247_p0, %p244_p13 }
 0x179   :  { %252 = shalt.err (!%p249_p1)
}
 0x17a   :  { %147 = dma.vmem_to_hbm [thread:$0]  %s142_s1, 256, %s316_s2, [#allocation4], %s258_s19, %s258_s19, %s259_s20  }
 0x17b   :  { %255 = dma.done.wait [#allocation4], 256  }
 0x17c   :  { %256 = vsyncadd [#allocation4], 4294967040 }
 0x17d   :  { %151 = vsyncpa [#allocation3], 1 }
 0x17e   :  { %152 = vsyncpa [#allocation4], 1 }

</bundles_post_ra>
